<compile_context>
chip_gen: v6e
topology: v6e:2x2x1
jax: 0.10.0
libtpu: 0.0.40
codegen_flags: <defaults>
</compile_context>

<pallas_src>
import jax
import jax.numpy as jnp
from jax.experimental import pallas as pl
from jax.experimental.pallas import tpu as pltpu


def _round_up(x, m):
    return ((x + m - 1) // m) * m


def _round_down(x, m):
    return (x // m) * m


def _vmem_capacity_bytes():
    """Physical VMEM of the local TPU generation (v5e/v6e: 128 MiB, v7x: 64 MiB)."""
    try:
        cap = int(pltpu.get_tpu_info().vmem_capacity_bytes)
        if cap > 0:
            return cap
    except Exception:
        pass
    return 64 * 1024 * 1024          # conservative default (fits v7x too)


# ----------------------------------------------------------------------------
# Main path: small-vocab table resident in VMEM, gather via one-hot matmul on
# the MXU.  Output blocks are sublane/lane dense -> unmasked vst + dense DMA
# writeback; the kernel is HBM-writeback bound at these shapes.
# ----------------------------------------------------------------------------
def _onehot_gather_kernel(idx_ref, tab_ref, out_ref):
    # idx_ref: (TILE_ROWS, 1) int32 in VMEM
    # tab_ref: (prefers, embed) full table, VMEM resident (constant block index)
    # out_ref: (TILE_ROWS, embed)
    idx = idx_ref[...]                                     # (TQ, 1)
    tq = idx.shape[0]
    prefers = tab_ref.shape[0]
    # one_hot[r, p] = (idx[r] == p); route the gather through the MXU.
    col = jax.lax.broadcasted_iota(jnp.int32, (tq, prefers), 1)
    one_hot = (col == idx).astype(tab_ref.dtype)           # (TQ, prefers)
    # Exactness: one-hot rows are exact 0/1 and Mosaic's f32 matmul lowering
    # reproduces the table rows to within the 1e-6 tolerance checked in the
    # self-test below (verified on hardware with the default precision).
    out_ref[...] = jnp.dot(
        one_hot, tab_ref[...], preferred_element_type=jnp.float32
    ).astype(out_ref.dtype)


def _resident_table_gather(flat_idx, table, tile_rows, needed_bytes, vmem_cap):
    n = flat_idx.shape[0]
    prefers, embed = table.shape

    idx2d = flat_idx.reshape(n, 1)                 # no padding, no output slice
    grid = pl.cdiv(n, tile_rows)                   # ragged last block is masked

    vmem_limit = int(min(max(needed_bytes + (4 << 20), 32 << 20),
                         vmem_cap - (2 << 20)))

    return pl.pallas_call(
        _onehot_gather_kernel,
        out_shape=jax.ShapeDtypeStruct((n, embed), table.dtype),
        grid_spec=pltpu.PrefetchScalarGridSpec(
            num_scalar_prefetch=0,
            grid=(grid,),
            in_specs=[
                # Tile of indices for this grid step (lane dim = full dim 1).
                pl.BlockSpec((tile_rows, 1), lambda i: (i, 0)),
                # Whole embedding table, same block every step -> DMA'd once,
                # VMEM resident for the whole grid.
                pl.BlockSpec((prefers, embed), lambda i: (0, 0)),
            ],
            out_specs=pl.BlockSpec((tile_rows, embed), lambda i: (i, 0)),
        ),
        compiler_params=pltpu.CompilerParams(
            dimension_semantics=("parallel",),   # independent tiles -> v7x 2xTC
            vmem_limit_bytes=vmem_limit),
    )(idx2d, table)


# ----------------------------------------------------------------------------
# Fallback path (large vocab / table too big for VMEM): batched data-dependent
# row gather.  R rows per grid step, double-buffered manual DMAs from HBM.
# ----------------------------------------------------------------------------
_FALLBACK_ROWS = 16     # rows gathered per grid step (multiple of 8)


def _batched_row_gather_kernel(idx_ref, tab_hbm, out_ref, buf, sems):
    # idx_ref : (n_pad,) int32 in SMEM (scalar prefetch, padded to R multiple)
    # tab_hbm : (prefers, embed) raw HBM ref (memory_space=pl.ANY)
    # out_ref : (R, embed) output block in VMEM
    # buf     : (2, R, embed) VMEM scratch, double buffered across grid steps
    # sems    : (2, R) DMA semaphores (one per in-flight row copy)
    step = pl.program_id(0)
    nsteps = pl.num_programs(0)
    r_rows = out_ref.shape[0]

    def start_fetch(tile, slot):
        for r in range(r_rows):                     # static unroll, R is small
            row = idx_ref[tile * r_rows + r]
            pltpu.make_async_copy(
                tab_hbm.at[pl.ds(row, 1), :],
                buf.at[slot, pl.ds(r, 1), :],
                sems.at[slot, r],
            ).start()

    # Prime the pipeline on the first step.
    @pl.when(step == 0)
    def _():
        start_fetch(0, 0)

    # Prefetch the next tile into the other slot while this tile is consumed.
    @pl.when(step + 1 < nsteps)
    def _():
        start_fetch(step + 1, (step + 1) % 2)

    slot = step % 2
    for r in range(r_rows):
        pltpu.make_async_copy(
            tab_hbm.at[pl.ds(0, 1), :],
            buf.at[slot, pl.ds(r, 1), :],
            sems.at[slot, r],
        ).wait()
    out_ref[...] = buf[slot]


def _dma_row_gather(flat_idx, table, rows_per_step=_FALLBACK_ROWS):
    n = flat_idx.shape[0]
    prefers, embed = table.shape
    n_tiles = pl.cdiv(n, rows_per_step)
    n_pad = n_tiles * rows_per_step
    # Pad only the (tiny) index vector so every SMEM read / row DMA is in
    # bounds; rows produced from padding are dropped by the masked writeback
    # of the ragged last output block.
    idx_pad = jnp.zeros((n_pad,), jnp.int32).at[:n].set(flat_idx)

    return pl.pallas_call(
        _batched_row_gather_kernel,
        out_shape=jax.ShapeDtypeStruct((n, embed), table.dtype),
        grid_spec=pltpu.PrefetchScalarGridSpec(
            num_scalar_prefetch=1,
            grid=(n_tiles,),
            in_specs=[pl.BlockSpec(memory_space=pl.ANY)],     # table stays in HBM
            out_specs=pl.BlockSpec((rows_per_step, embed), lambda i, idx: (i, 0)),
            scratch_shapes=[
                pltpu.VMEM((2, rows_per_step, embed), table.dtype),
                pltpu.SemaphoreType.DMA((2, rows_per_step)),
            ],
        ),
        compiler_params=pltpu.CompilerParams(
            dimension_semantics=("arbitrary",)),   # manual cross-step pipeline
    )(idx_pad, table)


# ----------------------------------------------------------------------------
# Dispatcher (Userprelayer.forward equivalent).
# ----------------------------------------------------------------------------
_ONEHOT_MAX_PREFERS = 512        # above this, one-hot flops / intermediate cost
_SMALL_GATHER_BYTES = 16 * 1024  # below this, XLA's fused gather wins
_SMALL_GATHER_ROWS = 64


def userprelayer_forward(indices, embedding_table, *, tile_rows=1024):
    """Equivalent of Userprelayer.forward: embedding(inputs).view(-1, E)."""
    prefers, embed = embedding_table.shape
    itemsize = embedding_table.dtype.itemsize

    # TODO(synk): PyTorch nn.Embedding raises on out-of-range indices; we clamp
    # instead (no in-kernel raise facility), which also keeps the fallback's
    # data-dependent DMAs in bounds.
    flat_idx = jnp.clip(indices.reshape(-1).astype(jnp.int32), 0, prefers - 1)
    n = flat_idx.shape[0]

    if n == 0:
        return jnp.zeros((0, embed), embedding_table.dtype)

    # Tiny-problem fast path: launch/pipeline overhead dominates the work.
    if n < _SMALL_GATHER_ROWS or n * embed * itemsize <= _SMALL_GATHER_BYTES:
        return jnp.take(embedding_table, flat_idx, axis=0)

    # Tile selection: multiple of 8 rows (sublane dense), large (>=512-1024)
    # to amortize the ~0.35us/step grid overhead, but capped so
    #   (a) the grid has >= ~8 steps (keeps both v7x TensorCores busy), and
    #   (b) a double-buffered out tile stays <= ~4 MiB of VMEM.
    max_rows_for_vmem = max(8, _round_down((4 << 20) // (embed * itemsize), 8))
    min_eight_tiles = _round_up(pl.cdiv(n, 8), 8)
    tile_rows = max(8, min(tile_rows, min_eight_tiles, max_rows_for_vmem))

    # Generation-aware VMEM budget: ~3/4 of physical capacity
    # (v7x 64 MiB -> ~48 MiB, v5e/v6e 128 MiB -> ~96 MiB).
    vmem_cap = _vmem_capacity_bytes()
    budget = (3 * vmem_cap) // 4
    # NOTE: the table's block index is constant so the pipeline only DMAs it
    # once, but it is still allocated double-buffered; the budget accounts for
    # that (x2 on the table term).
    needed = (2 * prefers * embed * itemsize          # resident table (x2 bufs)
              + 2 * tile_rows * embed * itemsize      # double-buffered out tile
              + 2 * tile_rows * 4)                    # double-buffered idx tile

    if prefers <= _ONEHOT_MAX_PREFERS and needed <= budget:
        # TODO(synk): if bf16 embeddings are acceptable, pass a bf16 table —
        # this path is output-writeback bound, so halving bytes is ~2x.
        return _resident_table_gather(flat_idx, embedding_table, tile_rows,
                                      needed, vmem_cap)

    # Large vocab / table too big for VMEM: batched manual-DMA row gather.
    return _dma_row_gather(flat_idx, embedding_table)


if __name__ == "__main__":
    # Deterministic parameter / input construction (synthetic, no checkpoint).
    prefers = 16          # vocabulary size of the preference embedding
    embed_size = 128      # args.userpre_embed_size (lane-friendly)

    key = jax.random.PRNGKey(0)
    k_tab, k_idx1, k_idx2 = jax.random.split(key, 3)

    embedding_table = jax.random.normal(k_tab, (prefers, embed_size),
                                        dtype=jnp.float32)

    # Case 1: n = 375 rows -> ragged last tile on the resident Pallas path.
    inputs_a = jax.random.randint(k_idx1, (3, 125), 0, prefers, dtype=jnp.int32)
    out_a = jax.block_until_ready(userprelayer_forward(inputs_a, embedding_table))
    ref_a = jnp.take(embedding_table, inputs_a.reshape(-1), axis=0)
    assert out_a.shape == (3 * 125, embed_size)
    assert jnp.allclose(out_a, ref_a, atol=1e-6, rtol=1e-6), \
        "Pallas one-hot gather mismatch (ragged case)"

    # Case 2: n = 512 rows -> evenly tiled resident path.
    inputs_b = jax.random.randint(k_idx2, (4, 128), 0, prefers, dtype=jnp.int32)
    out_b = jax.block_until_ready(userprelayer_forward(inputs_b, embedding_table))
    ref_b = jnp.take(embedding_table, inputs_b.reshape(-1), axis=0)
    assert out_b.shape == (4 * 128, embed_size)
    assert jnp.allclose(out_b, ref_b, atol=1e-6, rtol=1e-6), \
        "Pallas one-hot gather mismatch (even case)"

    print("KERNEL_OK")
</pallas_src>

<mosaic_0001>
module attributes {stable_mosaic.version = 11 : i64} {
  func.func @_onehot_gather_kernel(%arg0: i32, %arg1: memref<48x1xi32, #tpu.memory_space<vmem>>, %arg2: memref<16x128xf32, #tpu.memory_space<vmem>>, %arg3: memref<48x128xf32, #tpu.memory_space<vmem>>) attributes {dimension_semantics = [#tpu.dimension_semantics<parallel>], iteration_bounds = array<i64: 8>, scalar_prefetch = 0 : i64, scratch_operands = 0 : i64, tpu.core_type = #tpu.core_type<tc>, window_params = [{transform_indices = @transform_0, window_bounds = array<i64: 48, 1>}, {pipeline_mode = #tpu.pipeline_mode<synchronous>, transform_indices = @transform_1, window_bounds = array<i64: 16, 128>}, {transform_indices = @transform_2, window_bounds = array<i64: 48, 128>}]} {
    %c0 = arith.constant 0 : index
    %c0_0 = arith.constant 0 : index
    %0 = vector.load %arg1[%c0, %c0_0] : memref<48x1xi32, #tpu.memory_space<vmem>>, vector<48x1xi32>
    %1 = tpu.iota {dimensions = array<i32: 1>} : vector<48x16xi32>
    %2 = vector.broadcast %0 : vector<48x1xi32> to vector<48x16xi32>
    %3 = arith.cmpi eq, %1, %2 : vector<48x16xi32>
    %4 = arith.extui %3 : vector<48x16xi1> to vector<48x16xi32>
    %5 = arith.sitofp %4 : vector<48x16xi32> to vector<48x16xf32>
    %c0_1 = arith.constant 0 : index
    %c0_2 = arith.constant 0 : index
    %6 = vector.load %arg2[%c0_1, %c0_2] : memref<16x128xf32, #tpu.memory_space<vmem>>, vector<16x128xf32>
    %cst = arith.constant dense<0.000000e+00> : vector<48x128xf32>
    %7 = tpu.matmul %5, %6, %cst {dimension_numbers = #tpu.dot_dimension_numbers<[1], [0], [0], [1], [0, 0, 1, 1], [], []>} : vector<48x16xf32>, vector<16x128xf32>, vector<48x128xf32> -> vector<48x128xf32>
    %c0_3 = arith.constant 0 : index
    %c0_4 = arith.constant 0 : index
    %8 = vector.load %arg3[%c0_3, %c0_4] : memref<48x128xf32, #tpu.memory_space<vmem>>, vector<48x128xf32>
    tpu.vector_store %arg3[%c0_3, %c0_4], %7 {strides = array<i32>} : memref<48x128xf32, #tpu.memory_space<vmem>>, vector<48x128xf32>,
    return
  }
  func.func @transform_0(%arg0: i32) -> (i32, i32) {
    %c0_i32 = arith.constant 0 : i32
    %c0_i32_0 = arith.constant 0 : i32
    return %arg0, %c0_i32 : i32, i32
  }
  func.func @transform_1(%arg0: i32) -> (i32, i32) {
    %c0_i32 = arith.constant 0 : i32
    %c0_i32_0 = arith.constant 0 : i32
    %c0_i32_1 = arith.constant 0 : i32
    return %c0_i32, %c0_i32_0 : i32, i32
  }
  func.func @transform_2(%arg0: i32) -> (i32, i32) {
    %c0_i32 = arith.constant 0 : i32
    %c0_i32_0 = arith.constant 0 : i32
    return %arg0, %c0_i32 : i32, i32
  }
}

</mosaic_0001>

<bundles_post_ra>
// kernel: tpu_custom_call.1
= control target key start
LH: loop header
LB: loop body
LE: loop exit
PB: predicated region body
PF: predicated region fallthrough
CT: control target
= control target key end

     0   :  { %7 = vsyncpa [#allocation3], 0  ;;  %s722_s0 = inlined_call_operand.vmem [shape: s32[375,1], index: 0, kind: input, shape index: {}]   ;;  %s723_s1 = inlined_call_operand.vmem [shape: f32[16,128], index: 1, kind: input, shape index: {}]   ;;  %s724_s2 = inlined_call_operand.hbm [shape: f32[375,128], index: 2, kind: output, shape index: {}]  }
   0x1   :  { %9 = vsyncpa [#allocation3 + $0x1], 0  ;;  %s594_s9 = smov 0   ;;  %s596_s10 = smov 0  }
   0x2   :  { %s598_s11 = smov 0   ;;  %s600_s12 = smov 0  }
   0x3 LB: > { %s615_s13 = sadd.s32 4294967295, %s572_s12   ;;  %s417_s14 = sadd.s32 4294967294, %s572_s12   ;;  %s572_s12 = sphi %s600_s12, %s730_s12   ;;  %s568_s11 = sphi %s598_s11, %s729_s11   ;;  %s564_s10 = sphi %s596_s10, %s728_s10   ;;  %s560_s9 = sphi %s594_s9, %s727_s9  }
   0x4   : > { %s619_s15 = sadd.s32 1, %s572_s12   ;;  %s69_s16 = sadd.s32 1, %s568_s11 }
   0x5   : > { %s66_s17 = ssub.s32 %s572_s12, %s619_s15  ;;  %p79_p0 = scmp.ne.s32.totalorder %s568_s11, %s564_s10 }
   0x6   : > { %p67_p1 = scmp.eq.s32.totalorder %s66_s17, 0  ;;  %p80_p2 = scmp.eq.s32.totalorder %s615_s13, 7 }
   0x7   : > { %p85_p3 = scmp.ne.s32.totalorder %s564_s10, %s560_s9  ;;  %p86_p4 = scmp.eq.s32.totalorder %s417_s14, 7 }
   0x8   : > { %s630_s18 = scalar_select %p67_p1, %s568_s11, %s69_s16  }
   0x9   : > { %p632_p5 = por %p80_p2, %p79_p0  ;;  %p636_p6 = por %p86_p4, %p85_p3 }
   0xa   : > { %p420_p7 = scmp.ge.s32.totalorder %s572_s12, 1  ;;  %p124_p8 = scmp.lt.s32.totalorder %s572_s12, 9 }
   0xc   : > { %p125_p9 = pnand %p420_p7, %p124_p8 }
   0xd   : > { %s643_s21 = smul.u32 (!%p125_p9), 6, %s615_s13  ;;  %s147_s3 = sand.u32 (!%p125_p9), 1, %s564_s10  }
   0xe   : > { %128 = sbr.rel (%p125_p9) target bundleno = 381 (0x17d), region = 28  ;;  %s663_s6 = scalar_lea.sflag (!%p125_p9), [#allocation3], %s147_s3 }
   0xf   : > { %p155_p10 = scmp.lt.s32.totalorder (!%p125_p9), %s643_s21, 46  ;;  %s467_s4 = smul.u32 (!%p125_p9), 48, %s147_s3 }
  0x11   : > { %s149_s5 = scalar_lea.vmem (!%p125_p9), [#allocation2], %s467_s4 }
  0x13   : > { %v574_v0 = vmov 0   ;;  %s156_s22 = scalar_select %p155_p10, %s643_s21, 46  ;;  %v214_v1 = vld [vmem:[%s723_s1 + $0x8] sm:$0xff]  ;;  %v213_v6 = vld [vmem:[%s723_s1] sm:$0xff]  ;;  %v175_v9 = vlaneseq  ;;  %vm215_vm0 = vcmask 130048   ;;  %v575_v13 = vmov 0.0  }
  0x14   : > { %511 = vset.pattern.permute.xlu1 %v574_v0  ;;  %510 = vset.pattern.permute.xlu0 %v574_v0  ;;  %s344_s7 = ssub.s32 (%p632_p5), 47, %s643_s21 }
  0x15   : > { %s421_s25 = sshll.u32 %s156_s22, 3  ;;  %463 = vmatprep.subr.mxu1 %v214_v1  ;;  %450 = vmatprep.subr.mxu0 %v214_v1  ;;  %v176_v10 = vand.u32 127, %v175_v9  ;;  %p345_p11 = scmp.lt.s32.totalorder (%p632_p5), %s344_s7, 6 }
  0x16   : > { %s158_s28 = scalar_lea.vmem %s722_s0, %s421_s25  ;;  %465 = vmatpush3.msra.mxu1 %v214_v1  ;;  %451 = vmatpush3.msra.mxu0 %v214_v1 }
  0x17   : > { %v171_v2 = vld [vmem:[%s158_s28 + $0x10] sm:$0xff]  ;;  %v169_v3 = vld [vmem:[%s158_s28] sm:$0xff]  ;;  %v172_v4 = vld [vmem:[%s158_s28 + $0x18] sm:$0xff]  ;;  %464 = vmatprep.subr.mxu1 %v213_v6  ;;  %452 = vmatprep.subr.mxu0 %v213_v6 }
  0x18   : > { %184 = vperm.xlu0 %510, %v171_v2   ;;  %178 = vperm.xlu1 %511, %v169_v3   ;;  %v173_v5 = vld [vmem:[%s158_s28 + $0x20] sm:$0xff]  ;;  %v170_v7 = vld [vmem:[%s158_s28 + $0x8] sm:$0xff] }
  0x19   : > { %466 = vmatpush3.msra.mxu1 %v213_v6  ;;  %453 = vmatpush3.msra.mxu0 %v213_v6  ;;  %v174_v8 = vld [vmem:[%s158_s28 + $0x28] sm:$0xff] }
  0x1c   : > { %187 = vperm.xlu0 %510, %v172_v4   ;;  %190 = vperm.xlu1 %511, %v173_v5  }
  0x20   : > { %181 = vperm.xlu0 %510, %v170_v7   ;;  %193 = vperm.xlu1 %511, %v174_v8  }
  0x93   : > { %v185_v11 = vpop.permute.xlu0 %184  ;;  %v179_v12 = vpop.permute.xlu1 %178 }
  0x94   : > { %vm197_vm1 = vcmp.eq.s32.totalorder %v176_v10, %v185_v11  ;;  %vm195_vm2 = vcmp.eq.s32.totalorder %v176_v10, %v179_v12 }
  0x95   : > { %v422_v14 = vsel %vm195_vm2, 1.0, %v575_v13  ;;  %v424_v15 = vsel %vm197_vm1, 1.0, %v575_v13 }
  0x96   : > { %454 = vmatprep.mubr.msk.f32.mxu0 %vm215_vm0, %v422_v14  ;;  %457 = vmatprep.mubr.msk.f32.mxu1 %vm215_vm0, %v424_v15 }
  0x97   : > { %v188_v16 = vpop.permute.xlu0 %187  ;;  %v191_v17 = vpop.permute.xlu1 %190 }
  0x98   : > { %vm198_vm3 = vcmp.eq.s32.totalorder %v176_v10, %v188_v16  ;;  %vm199_vm4 = vcmp.eq.s32.totalorder %v176_v10, %v191_v17 }
  0x99   : > { %v425_v18 = vsel %vm198_vm3, 1.0, %v575_v13  ;;  %v426_v19 = vsel %vm199_vm4, 1.0, %v575_v13 }
  0x9a   : > { %458 = vmatmul.mubr.msk.f32.vlgmr.msra.gmra.mxu1 %vm215_vm0, %v425_v18 }
  0x9b   : > { %v182_v20 = vpop.permute.xlu0 %181  ;;  %460 = vmatprep.mubr.msk.f32.mxu1 %vm215_vm0, %v426_v19  ;;  %v194_v21 = vpop.permute.xlu1 %193 }
  0x9c   : > { %vm196_vm5 = vcmp.eq.s32.totalorder %v176_v10, %v182_v20  ;;  %vm200_vm6 = vcmp.eq.s32.totalorder %v176_v10, %v194_v21 }
  0x9d   : > { %v423_v22 = vsel %vm196_vm5, 1.0, %v575_v13  ;;  %v427_v23 = vsel %vm200_vm6, 1.0, %v575_v13 }
  0x9e   : > { %455 = vmatmul.mubr.msk.f32.vlgmr.msra.gmra.mxu0 %vm215_vm0, %v423_v22  ;;  %461 = vmatmul.mubr.msk.f32.gmra.mxu1 %vm215_vm0, %v427_v23 }
 0x15a   : > { %v459_v24 = vpop.f32.mrf.mxu1 }
 0x15b   : > { %332 = vst [vmem:[%s149_s5 + $0x18] sm:$0xff] %v459_v24 }
 0x15c   : > { %v310_v25 = vpop.f32.mrf.mxu1 }
 0x15d   : > { %331 = vst [vmem:[%s149_s5 + $0x10] sm:$0xff] %v310_v25  ;;  %342 = sbr.rel (!%p632_p5) target bundleno = 381 (0x17d), region = 32 }
 0x15e   : > { %v456_v26 = vpop.f32.mrf.mxu0  ;;  %v462_v27 = vpop.f32.mrf.mxu1 }
 0x15f   : > { %330 = vst [vmem:[%s149_s5 + $0x8] sm:$0xff] %v456_v26  ;;  %334 = vst [vmem:[%s149_s5 + $0x28] sm:$0xff] %v462_v27 }
 0x160   : > { %v300_v28 = vpop.f32.mrf.mxu0  ;;  %v320_v29 = vpop.f32.mrf.mxu1 }
 0x161   : > { %329 = vst [vmem:[%s149_s5] sm:$0xff] %v300_v28  ;;  %333 = vst [vmem:[%s149_s5 + $0x20] sm:$0xff] %v320_v29 }
 0x162   : > { %s732_s7 = smov (!%p345_p11, %s344_s7), 6 }
 0x163   : > { %s668_s8 = sshll.u32 %s732_s7, 7 }
 0x164   : > { %s349_s14 = ssub.s32 768, %s668_s8 }
 0x165   : > { %350 = vsyncadd %s663_s6, %s349_s14  ;;  %p435_p12 = scmp.ne.s32.totalorder %s668_s8, 0  ;;  %s441_s16 = smul.u32 768, %s615_s13 }
 0x166   : > { %s355_s17 = sshll.u32 %s149_s5, 4  ;;  %s576_s24 = smov [#allocation2]   ;;  %s679_s17 = int_to_ptr.vmem [resolvable:$true] %s355_s17 }
 0x167   : > { %s677_s23 = scalar_lea.hbm %s724_s2, %s441_s16  ;;  %s512_s21 = scalar_lea.vmem %s679_s17, %s668_s8 }
 0x168   : > { %p513_p13 = scmp.ne.s32.totalorder %s679_s17, %s512_s21  ;;  %s516_s25 = sshll.u32 %s576_s24, 4  ;;  %s517_s25 = int_to_ptr.vmem [resolvable:$false] %s516_s25 }
 0x169   : > { %s518_s13 = scalar_lea.vmem %s517_s25, 1536  ;;  %p519_p2 = scmp.lt.s32.totalorder %s679_s17, %s517_s25 }
 0x16a   : > { %p514_p0 = pnand %p513_p13, %p435_p12  ;;  %p520_p3 = scmp.lt.s32.totalorder %s518_s13, %s512_s21 }
 0x16c   : > { %p515_p1 = pneg %p514_p0  ;;  %p521_p4 = por %p520_p3, %p519_p2 }
 0x16e   : > { %p522_p5 = pnand %p521_p4, %p515_p1 }
 0x170   : > { %525 = shalt.err (!%p522_p5)
}
 0x171   : > { %s526_s26 = scalar_lea.hbm %s677_s23, %s668_s8  ;;  %s530_s29 = scalar_lea.hbm %s724_s2, 6016 }
 0x172   : > { %p527_p7 = scmp.ne.s32.totalorder %s677_s23, %s526_s26  ;;  %p531_p10 = scmp.lt.s32.totalorder %s677_s23, %s724_s2 }
 0x173   : > { %p532_p11 = scmp.lt.s32.totalorder %s530_s29, %s526_s26 }
 0x174   : > { %p528_p8 = pnand %p527_p7, %p435_p12 }
 0x175   : > { %p533_p13 = por %p532_p11, %p531_p10 }
 0x176   : > { %p529_p9 = pneg %p528_p8 }
 0x178   : > { %p534_p0 = pnand %p533_p13, %p529_p9 }
 0x17a   : > { %537 = shalt.err (!%p534_p0)
}
 0x17b   : > { %s577_s4 = smov 128   ;;  %s578_s5 = smov 8  }
 0x17c   : > { %361 = dma.vmem_to_hbm [thread:$0]  (%p435_p12), %s679_s17, %s668_s8, %s677_s23, %s663_s6, %s577_s4, %s577_s4, %s578_s5  }
 0x17d PF: > { %p473_p1 = scmp.ge.s32.totalorder %s572_s12, 2  ;;  %s370_s7 = sand.u32 1, %s560_s9  }
 0x17e   : > { %s371_s14 = scalar_lea.sflag [#allocation3], %s370_s7 }
 0x17f   : > { %p470_p2 = pnand %p473_p1, %p636_p6 }
 0x181   : > { %p471_p3 = pneg %p470_p2 }
 0x183   : > { %555 = dma.done.wait (%p471_p3), %s371_s14, 768  }
 0x184   : > { %557 = vsyncadd (%p471_p3), %s371_s14, 4294966528  ;;  %p12_p4 = scmp.ge.s32.totalorder %s619_s15, 10   ;;  %s727_s9 = smov %s564_s10 }
 0x185   : > { %s728_s10 = smov %s568_s11  ;;  %s729_s11 = smov %s630_s18 }
 0x186   : > { %s730_s12 = smov %s619_s15  ;;  %14 = sbr.rel (!%p12_p4) target bundleno = 3 (0x3), region = 63 }
 0x18b   :  { %376 = vsyncpa [#allocation3], 1 }
 0x18c   :  { %378 = vsyncpa [#allocation3 + $0x1], 1 }

</bundles_post_ra>
